<compile_context>
chip_gen: v6e
topology: v6e:2x2x1
jax: 0.10.0
libtpu: 0.0.40
codegen_flags: <defaults>
</compile_context>

<pallas_src>
from functools import partial

import jax
import jax.numpy as jnp
from jax.experimental import pallas as pl
from jax.experimental.pallas import tpu as pltpu

_EPS = 1e-5


# ----------------------------- parameter setup ------------------------------

def _bn_params(key, c):
    kg, kb, km, kv = jax.random.split(key, 4)
    return dict(
        gamma=jax.random.uniform(kg, (c,), jnp.float32, 0.5, 1.5),
        beta=jax.random.normal(kb, (c,), jnp.float32) * 0.1,
        mean=jax.random.normal(km, (c,), jnp.float32) * 0.1,
        var=jax.random.uniform(kv, (c,), jnp.float32, 0.5, 1.5),
    )


def _bn_scale_shift(gamma, beta, mean, var):
    scale = gamma / jnp.sqrt(var + _EPS)
    shift = beta - mean * scale
    return scale.astype(jnp.float32), shift.astype(jnp.float32)


def _block_circulant(key, cout, cin, b):
    """Build a (cout, cin) block-circulant weight: each b x b block is circulant."""
    assert cout % b == 0 and cin % b == 0
    base = jax.random.normal(key, (cout // b, cin // b, b), jnp.float32) * 0.1
    i = jnp.arange(b)[:, None]
    j = jnp.arange(b)[None, :]
    idx = (i - j) % b                      # circulant index pattern (b, b)
    blocks = base[:, :, idx]               # (cout/b, cin/b, b, b)
    return blocks.transpose(0, 2, 1, 3).reshape(cout, cin)


def init_params(key, inp, oup, expand_ratio, block_size):
    hidden = round(inp * expand_ratio)
    ks = jax.random.split(key, 8)
    p = {}
    if expand_ratio != 1:
        p["w_cir1"] = _block_circulant(ks[0], hidden, inp, block_size)   # (hidden, inp)
        p["bn1"] = _bn_params(ks[1], hidden)
    # depthwise 3x3 weight in PyTorch layout (hidden, 1, 3, 3)
    p["w_dw"] = jax.random.normal(ks[2], (hidden, 1, 3, 3), jnp.float32) * (1.0 / 3.0)
    p["bn_dw"] = _bn_params(ks[3], hidden)
    if expand_ratio != 1:
        p["w_cir2"] = _block_circulant(ks[4], oup, hidden, block_size)   # (oup, hidden)
    else:
        p["w_pw"] = jax.random.normal(ks[4], (oup, hidden), jnp.float32) * 0.1
    p["bn2"] = _bn_params(ks[5], oup)
    return p


# ------------------------------ fused Pallas kernel -------------------------------

def _fused_block_kernel(*refs, has_expand, use_res, use_sel, sel_first, w_spatial):
    """Whole inverted-residual block for one image, in (C, H*W) layout.

    refs (in order): x, [w1, b1], wdw, bdw, w2, b2, [sel], out
      x   : (1, Cin, H*W)            input image (NCHW flattened spatially)
      w1  : (hidden, Cin)            expand 1x1, BN scale pre-folded
      b1  : (hidden, 1)              BN shift
      wdw : (hidden, 9)              depthwise taps (kh*3+kw), BN scale pre-folded
      bdw : (hidden, 1)              BN shift
      w2  : (oup, hidden)            project 1x1, BN scale pre-folded
      b2  : (oup, 1)                 BN shift
      sel : (H*W, Ho*Wo)             stride-2 even-position selector (only if use_sel)
      out : (1, oup, Ho*Wo)
    """
    o_ref = refs[-1]
    it = iter(refs[:-1])
    x_ref = next(it)
    if has_expand:
        w1_ref, b1_ref = next(it), next(it)
    wdw_ref, bdw_ref = next(it), next(it)
    w2_ref, b2_ref = next(it), next(it)
    sel_ref = next(it) if use_sel else None

    W = w_spatial
    x = x_ref[0].astype(jnp.float32)                       # (Cin, HW)
    n = x.shape[1]                                         # HW (static)

    # ---- expand 1x1 + BN + ReLU6 (lane-dense MXU matmul) ----
    if has_expand:
        hid = jnp.dot(w1_ref[...], x, preferred_element_type=jnp.float32) + b1_ref[...]
        hid = jnp.clip(hid, 0.0, 6.0)                      # (hidden, HW)
    else:
        hid = x

    C = hid.shape[0]

    # ---- depthwise 3x3 + BN + ReLU6 via static lane shifts ----
    # Column index of each flattened spatial position (for the left/right halo masks).
    col = jax.lax.broadcasted_iota(jnp.int32, (1, n), 1) % W
    # For each horizontal tap offset kw, pre-zero the input column that a flattened
    # lane shift would wrap into, then zero-pad ONCE so every tap below is a single
    # static slice (no per-tap zeros/concat).
    P = W + 1                                              # >= max |shift|
    zpad = jnp.zeros((C, P), jnp.float32)
    pads = []
    for kw in range(3):
        if kw == 0:
            src = jnp.where(col == W - 1, 0.0, hid)        # sources for kw = 0 taps
        elif kw == 2:
            src = jnp.where(col == 0, 0.0, hid)            # sources for kw = 2 taps
        else:
            src = hid                                      # kw = 1
        pads.append(jnp.concatenate([zpad, src, zpad], axis=1))   # (C, HW + 2P)

    wdw = wdw_ref[...]                                     # (C, 9)
    acc = jnp.zeros_like(hid)
    for kh in range(3):
        for kw in range(3):
            s = (kh - 1) * W + (kw - 1)                    # static flattened shift
            if s == 0:
                shifted = hid                              # center tap, unmasked source
            else:
                shifted = pads[kw][:, P + s:P + s + n]     # zero-filled lane shift
            k = kh * 3 + kw
            acc = acc + shifted * wdw[:, k:k + 1]          # per-channel tap (VPU FMA)
    d = jnp.clip(acc + bdw_ref[...], 0.0, 6.0)             # (hidden, HW)

    # ---- project 1x1 + BN (+ stride-2 subsample while resident, + residual) ----
    if use_sel and sel_first:
        d = jnp.dot(d, sel_ref[...], preferred_element_type=jnp.float32)   # (hidden, HoWo)
    out = jnp.dot(w2_ref[...], d, preferred_element_type=jnp.float32)
    if use_sel and not sel_first:
        out = jnp.dot(out, sel_ref[...], preferred_element_type=jnp.float32)  # (oup, HoWo)
    out = out + b2_ref[...]
    if use_res:
        out = out + x                                      # stride==1 and inp==oup
    o_ref[0] = out.astype(o_ref.dtype)


# ------------------------------- wrapper ---------------------------------

def _stride2_selector(h, w):
    """(h*w, ho*wo) 0/1 matrix selecting even (row, col) positions."""
    ho, wo = (h + 1) // 2, (w + 1) // 2
    src = (2 * jnp.arange(ho)[:, None] * w + 2 * jnp.arange(wo)[None, :]).reshape(-1)
    sel = jnp.zeros((h * w, ho * wo), jnp.float32)
    return sel.at[src, jnp.arange(ho * wo)].set(1.0)


def cir_nas_inverted_residual(x_nchw, params, *, inp, oup, stride, expand_ratio):
    assert stride in (1, 2)
    hidden = round(inp * expand_ratio)
    use_res = (stride == 1) and (inp == oup)
    has_expand = expand_ratio != 1
    use_sel = stride == 2

    n, c, h, w = x_nchw.shape
    hw = h * w
    ho, wo = ((h + 1) // 2, (w + 1) // 2) if stride == 2 else (h, w)
    howo = ho * wo

    # Apply the stride-2 subsample before or after the projection matmul, whichever
    # order costs fewer MXU MACs (trace-time decision).
    if use_sel:
        macs_sel_first = hidden * hw * howo + oup * hidden * howo
        macs_proj_first = oup * hidden * hw + oup * hw * howo
        sel_first = macs_sel_first <= macs_proj_first
    else:
        sel_first = False

    x3 = x_nchw.reshape(n, c, hw).astype(jnp.float32)      # (N, C, H*W): no transpose

    # Fold BN scale into the conv weights; keep only the shift as an in-kernel bias.
    if has_expand:
        s1, b1 = _bn_scale_shift(**params["bn1"])
        w1 = params["w_cir1"] * s1[:, None]                # (hidden, c)
        b1c = b1.reshape(hidden, 1)
    sdw, bdw = _bn_scale_shift(**params["bn_dw"])
    wdw = params["w_dw"][:, 0].reshape(hidden, 9) * sdw[:, None]   # (hidden, 9)
    bdwc = bdw.reshape(hidden, 1)
    s2, b2 = _bn_scale_shift(**params["bn2"])
    w2raw = params["w_cir2"] if has_expand else params["w_pw"]
    w2 = w2raw * s2[:, None]                               # (oup, hidden)
    b2c = b2.reshape(oup, 1)

    def const_spec(shape):
        # Constant index_map => the weight block stays resident in VMEM across the
        # whole batch grid (single DMA, no per-step re-copy).
        return pl.BlockSpec(shape, lambda i, _s=len(shape): (0,) * _s)

    inputs = [x3]
    in_specs = [pl.BlockSpec((1, c, hw), lambda i: (i, 0, 0))]
    if has_expand:
        inputs += [w1, b1c]
        in_specs += [const_spec((hidden, c)), const_spec((hidden, 1))]
    inputs += [wdw, bdwc, w2, b2c]
    in_specs += [const_spec((hidden, 9)), const_spec((hidden, 1)),
                 const_spec((oup, hidden)), const_spec((oup, 1))]
    if use_sel:
        inputs.append(_stride2_selector(h, w))
        in_specs.append(const_spec((hw, howo)))

    out = pl.pallas_call(
        partial(_fused_block_kernel, has_expand=has_expand, use_res=use_res,
                use_sel=use_sel, sel_first=sel_first, w_spatial=w),
        out_shape=jax.ShapeDtypeStruct((n, oup, howo), jnp.float32),
        grid=(n,),
        in_specs=in_specs,
        out_specs=pl.BlockSpec((1, oup, howo), lambda i: (i, 0, 0)),
        compiler_params=pltpu.CompilerParams(dimension_semantics=("parallel",)),
    )(*inputs)

    return out.reshape(n, oup, ho, wo)                     # already NCHW


# ------------------------------ pure-JAX reference -----------------------------

def reference_forward(x_nchw, params, *, inp, oup, stride, expand_ratio):
    hidden = round(inp * expand_ratio)
    use_res = (stride == 1) and (inp == oup)
    x = x_nchw.astype(jnp.float32)
    y = x
    if expand_ratio != 1:
        s1, b1 = _bn_scale_shift(**params["bn1"])
        y = jnp.einsum("nchw,oc->nohw", y, params["w_cir1"])
        y = y * s1[None, :, None, None] + b1[None, :, None, None]
        y = jnp.clip(y, 0.0, 6.0)
    sdw, bdw = _bn_scale_shift(**params["bn_dw"])
    y = jax.lax.conv_general_dilated(
        y, params["w_dw"], window_strides=(stride, stride), padding=((1, 1), (1, 1)),
        dimension_numbers=("NCHW", "OIHW", "NCHW"), feature_group_count=hidden)
    y = jnp.clip(y * sdw[None, :, None, None] + bdw[None, :, None, None], 0.0, 6.0)
    s2, b2 = _bn_scale_shift(**params["bn2"])
    w2 = params["w_cir2"] if expand_ratio != 1 else params["w_pw"]
    y = jnp.einsum("nchw,oc->nohw", y, w2)
    y = y * s2[None, :, None, None] + b2[None, :, None, None]
    if use_res:
        y = y + x
    return y


# ------------------------------------ main -------------------------------------

if __name__ == "__main__":
    key = jax.random.PRNGKey(0)
    batch = 2

    configs = [
        # main config: residual branch active
        dict(inp=8, oup=8, stride=1, expand_ratio=3, feature_size=16, block_size=4),
        # stride-2 (in-kernel subsample path)
        dict(inp=8, oup=16, stride=2, expand_ratio=3, feature_size=16, block_size=4),
        # expand_ratio == 1 (no expand conv), residual active
        dict(inp=16, oup=16, stride=1, expand_ratio=1, feature_size=16, block_size=4),
    ]

    for idx, cfg in enumerate(configs):
        kk = jax.random.fold_in(key, idx)
        k_x, k_p = jax.random.split(kk)
        fs = cfg["feature_size"]
        x = jax.random.normal(k_x, (batch, cfg["inp"], fs, fs), jnp.float32)
        params = init_params(k_p, cfg["inp"], cfg["oup"], cfg["expand_ratio"],
                             cfg["block_size"])

        out = cir_nas_inverted_residual(
            x, params, inp=cfg["inp"], oup=cfg["oup"],
            stride=cfg["stride"], expand_ratio=cfg["expand_ratio"])
        out = jax.block_until_ready(out)

        ref = reference_forward(
            x, params, inp=cfg["inp"], oup=cfg["oup"],
            stride=cfg["stride"], expand_ratio=cfg["expand_ratio"])

        ho = (fs + 1) // 2 if cfg["stride"] == 2 else fs
        assert out.shape == (batch, cfg["oup"], ho, ho), (idx, out.shape)
        err = float(jnp.max(jnp.abs(out - ref)))
        if not bool(jnp.allclose(out, ref, atol=1e-3, rtol=1e-3)):
            raise AssertionError(
                f"config {idx}: mismatch vs reference, max abs diff = {err}")

    print("KERNEL_OK")
</pallas_src>

<mosaic_0001>
module attributes {stable_mosaic.version = 11 : i64} {
  func.func @_fused_block_kernel(%arg0: i32, %arg1: memref<1x8x256xf32, #tpu.memory_space<vmem>>, %arg2: memref<24x8xf32, #tpu.memory_space<vmem>>, %arg3: memref<24x1xf32, #tpu.memory_space<vmem>>, %arg4: memref<24x9xf32, #tpu.memory_space<vmem>>, %arg5: memref<24x1xf32, #tpu.memory_space<vmem>>, %arg6: memref<8x24xf32, #tpu.memory_space<vmem>>, %arg7: memref<8x1xf32, #tpu.memory_space<vmem>>, %arg8: memref<1x8x256xf32, #tpu.memory_space<vmem>>) attributes {dimension_semantics = [#tpu.dimension_semantics<parallel>], iteration_bounds = array<i64: 2>, scalar_prefetch = 0 : i64, scratch_operands = 0 : i64, tpu.core_type = #tpu.core_type<tc>, window_params = [{transform_indices = @transform_0, window_bounds = array<i64: 1, 8, 256>}, {pipeline_mode = #tpu.pipeline_mode<synchronous>, transform_indices = @transform_1, window_bounds = array<i64: 24, 8>}, {pipeline_mode = #tpu.pipeline_mode<synchronous>, transform_indices = @transform_2, window_bounds = array<i64: 24, 1>}, {pipeline_mode = #tpu.pipeline_mode<synchronous>, transform_indices = @transform_3, window_bounds = array<i64: 24, 9>}, {pipeline_mode = #tpu.pipeline_mode<synchronous>, transform_indices = @transform_4, window_bounds = array<i64: 24, 1>}, {pipeline_mode = #tpu.pipeline_mode<synchronous>, transform_indices = @transform_5, window_bounds = array<i64: 8, 24>}, {pipeline_mode = #tpu.pipeline_mode<synchronous>, transform_indices = @transform_6, window_bounds = array<i64: 8, 1>}, {transform_indices = @transform_7, window_bounds = array<i64: 1, 8, 256>}]} {
    %c0 = arith.constant 0 : index
    %c0_0 = arith.constant 0 : index
    %c0_1 = arith.constant 0 : index
    %0 = vector.load %arg1[%c0, %c0_0, %c0_1] : memref<1x8x256xf32, #tpu.memory_space<vmem>>, vector<1x8x256xf32>
    %1 = vector.shape_cast %0 : vector<1x8x256xf32> to vector<8x256xf32>
    %c0_2 = arith.constant 0 : index
    %c0_3 = arith.constant 0 : index
    %2 = vector.load %arg2[%c0_2, %c0_3] : memref<24x8xf32, #tpu.memory_space<vmem>>, vector<24x8xf32>
    %cst = arith.constant dense<0.000000e+00> : vector<24x256xf32>
    %3 = tpu.matmul %2, %1, %cst {dimension_numbers = #tpu.dot_dimension_numbers<[1], [0], [0], [1], [0, 0, 1, 1], [], []>} : vector<24x8xf32>, vector<8x256xf32>, vector<24x256xf32> -> vector<24x256xf32>
    %c0_4 = arith.constant 0 : index
    %c0_5 = arith.constant 0 : index
    %4 = vector.load %arg3[%c0_4, %c0_5] : memref<24x1xf32, #tpu.memory_space<vmem>>, vector<24x1xf32>
    %5 = vector.broadcast %4 : vector<24x1xf32> to vector<24x256xf32>
    %6 = arith.addf %3, %5 : vector<24x256xf32>
    %cst_6 = arith.constant 0.000000e+00 : f32
    %cst_7 = arith.constant 6.000000e+00 : f32
    %7 = vector.broadcast %cst_6 : f32 to vector<24x256xf32>
    %8 = arith.maximumf %7, %6 : vector<24x256xf32>
    %9 = vector.broadcast %cst_7 : f32 to vector<24x256xf32>
    %10 = arith.minimumf %9, %8 : vector<24x256xf32>
    %11 = tpu.iota {dimensions = array<i32: 1>} : vector<1x256xi32>
    %c16_i32 = arith.constant 16 : i32
    %c0_i32 = arith.constant 0 : i32
    %12 = arith.cmpi eq, %c16_i32, %c0_i32 : i32
    %c1_i32 = arith.constant 1 : i32
    %13 = arith.select %12, %c1_i32, %c16_i32 : i32
    %14 = vector.broadcast %13 : i32 to vector<1x256xi32>
    %15 = arith.remsi %11, %14 : vector<1x256xi32>
    %c0_i32_8 = arith.constant 0 : i32
    %16 = vector.broadcast %c0_i32_8 : i32 to vector<1x256xi32>
    %17 = arith.cmpi ne, %15, %16 : vector<1x256xi32>
    %c0_i32_9 = arith.constant 0 : i32
    %18 = vector.broadcast %c0_i32_9 : i32 to vector<1x256xi32>
    %19 = arith.cmpi slt, %15, %18 : vector<1x256xi32>
    %c0_i32_10 = arith.constant 0 : i32
    %20 = arith.cmpi slt, %13, %c0_i32_10 : i32
    %21 = vector.broadcast %20 : i1 to vector<1x256xi1>
    %22 = vector.broadcast %21 : vector<1x256xi1> to vector<1x256xi1>
    %23 = arith.xori %19, %22 : vector<1x256xi1>
    %24 = arith.andi %23, %17 : vector<1x256xi1>
    %25 = vector.broadcast %13 : i32 to vector<1x256xi32>
    %26 = arith.addi %15, %25 : vector<1x256xi32>
    %27 = arith.select %24, %26, %15 : vector<1x256xi1>, vector<1x256xi32>
    %cst_11 = arith.constant 0.000000e+00 : f32
    %28 = vector.broadcast %cst_11 : f32 to vector<24x17xf32>
    %c15_i32 = arith.constant 15 : i32
    %29 = vector.broadcast %c15_i32 : i32 to vector<1x256xi32>
    %30 = arith.cmpi eq, %27, %29 : vector<1x256xi32>
    %cst_12 = arith.constant 0.000000e+00 : f32
    %31 = vector.shape_cast %30 : vector<1x256xi1> to vector<1x256xi1>
    %32 = vector.broadcast %31 : vector<1x256xi1> to vector<24x256xi1>
    %33 = vector.broadcast %cst_12 : f32 to vector<24x256xf32>
    %34 = arith.select %32, %33, %10 : vector<24x256xi1>, vector<24x256xf32>
    %35 = tpu.concatenate %28, %34, %28 in 1 : vector<24x17xf32>, vector<24x256xf32>, vector<24x17xf32> -> vector<24x290xf32>
    %36 = tpu.concatenate %28, %10, %28 in 1 : vector<24x17xf32>, vector<24x256xf32>, vector<24x17xf32> -> vector<24x290xf32>
    %c0_i32_13 = arith.constant 0 : i32
    %37 = vector.broadcast %c0_i32_13 : i32 to vector<1x256xi32>
    %38 = arith.cmpi eq, %27, %37 : vector<1x256xi32>
    %cst_14 = arith.constant 0.000000e+00 : f32
    %39 = vector.shape_cast %38 : vector<1x256xi1> to vector<1x256xi1>
    %40 = vector.broadcast %39 : vector<1x256xi1> to vector<24x256xi1>
    %41 = vector.broadcast %cst_14 : f32 to vector<24x256xf32>
    %42 = arith.select %40, %41, %10 : vector<24x256xi1>, vector<24x256xf32>
    %43 = tpu.concatenate %28, %42, %28 in 1 : vector<24x17xf32>, vector<24x256xf32>, vector<24x17xf32> -> vector<24x290xf32>
    %c0_15 = arith.constant 0 : index
    %c0_16 = arith.constant 0 : index
    %44 = vector.load %arg4[%c0_15, %c0_16] : memref<24x9xf32, #tpu.memory_space<vmem>>, vector<24x9xf32>
    %cst_17 = arith.constant 0.000000e+00 : f32
    %45 = vector.broadcast %cst_17 : f32 to vector<24x256xf32>
    %46 = vector.extract_strided_slice %35 {offsets = [0, 0], sizes = [24, 256], strides = [1, 1]} : vector<24x290xf32> to vector<24x256xf32>
    %47 = vector.extract_strided_slice %44 {offsets = [0, 0], sizes = [24, 1], strides = [1, 1]} : vector<24x9xf32> to vector<24x1xf32>
    %48 = vector.broadcast %47 : vector<24x1xf32> to vector<24x256xf32>
    %49 = arith.mulf %46, %48 : vector<24x256xf32>
    %50 = arith.addf %45, %49 : vector<24x256xf32>
    %51 = vector.extract_strided_slice %36 {offsets = [0, 1], sizes = [24, 256], strides = [1, 1]} : vector<24x290xf32> to vector<24x256xf32>
    %52 = vector.extract_strided_slice %44 {offsets = [0, 1], sizes = [24, 1], strides = [1, 1]} : vector<24x9xf32> to vector<24x1xf32>
    %53 = vector.broadcast %52 : vector<24x1xf32> to vector<24x256xf32>
    %54 = arith.mulf %51, %53 : vector<24x256xf32>
    %55 = arith.addf %50, %54 : vector<24x256xf32>
    %56 = vector.extract_strided_slice %43 {offsets = [0, 2], sizes = [24, 256], strides = [1, 1]} : vector<24x290xf32> to vector<24x256xf32>
    %57 = vector.extract_strided_slice %44 {offsets = [0, 2], sizes = [24, 1], strides = [1, 1]} : vector<24x9xf32> to vector<24x1xf32>
    %58 = vector.broadcast %57 : vector<24x1xf32> to vector<24x256xf32>
    %59 = arith.mulf %56, %58 : vector<24x256xf32>
    %60 = arith.addf %55, %59 : vector<24x256xf32>
    %61 = vector.extract_strided_slice %35 {offsets = [0, 16], sizes = [24, 256], strides = [1, 1]} : vector<24x290xf32> to vector<24x256xf32>
    %62 = vector.extract_strided_slice %44 {offsets = [0, 3], sizes = [24, 1], strides = [1, 1]} : vector<24x9xf32> to vector<24x1xf32>
    %63 = vector.broadcast %62 : vector<24x1xf32> to vector<24x256xf32>
    %64 = arith.mulf %61, %63 : vector<24x256xf32>
    %65 = arith.addf %60, %64 : vector<24x256xf32>
    %66 = vector.extract_strided_slice %44 {offsets = [0, 4], sizes = [24, 1], strides = [1, 1]} : vector<24x9xf32> to vector<24x1xf32>
    %67 = vector.broadcast %66 : vector<24x1xf32> to vector<24x256xf32>
    %68 = arith.mulf %10, %67 : vector<24x256xf32>
    %69 = arith.addf %65, %68 : vector<24x256xf32>
    %70 = vector.extract_strided_slice %43 {offsets = [0, 18], sizes = [24, 256], strides = [1, 1]} : vector<24x290xf32> to vector<24x256xf32>
    %71 = vector.extract_strided_slice %44 {offsets = [0, 5], sizes = [24, 1], strides = [1, 1]} : vector<24x9xf32> to vector<24x1xf32>
    %72 = vector.broadcast %71 : vector<24x1xf32> to vector<24x256xf32>
    %73 = arith.mulf %70, %72 : vector<24x256xf32>
    %74 = arith.addf %69, %73 : vector<24x256xf32>
    %75 = vector.extract_strided_slice %35 {offsets = [0, 32], sizes = [24, 256], strides = [1, 1]} : vector<24x290xf32> to vector<24x256xf32>
    %76 = vector.extract_strided_slice %44 {offsets = [0, 6], sizes = [24, 1], strides = [1, 1]} : vector<24x9xf32> to vector<24x1xf32>
    %77 = vector.broadcast %76 : vector<24x1xf32> to vector<24x256xf32>
    %78 = arith.mulf %75, %77 : vector<24x256xf32>
    %79 = arith.addf %74, %78 : vector<24x256xf32>
    %80 = vector.extract_strided_slice %36 {offsets = [0, 33], sizes = [24, 256], strides = [1, 1]} : vector<24x290xf32> to vector<24x256xf32>
    %81 = vector.extract_strided_slice %44 {offsets = [0, 7], sizes = [24, 1], strides = [1, 1]} : vector<24x9xf32> to vector<24x1xf32>
    %82 = vector.broadcast %81 : vector<24x1xf32> to vector<24x256xf32>
    %83 = arith.mulf %80, %82 : vector<24x256xf32>
    %84 = arith.addf %79, %83 : vector<24x256xf32>
    %85 = vector.extract_strided_slice %43 {offsets = [0, 34], sizes = [24, 256], strides = [1, 1]} : vector<24x290xf32> to vector<24x256xf32>
    %86 = vector.extract_strided_slice %44 {offsets = [0, 8], sizes = [24, 1], strides = [1, 1]} : vector<24x9xf32> to vector<24x1xf32>
    %87 = vector.broadcast %86 : vector<24x1xf32> to vector<24x256xf32>
    %88 = arith.mulf %85, %87 : vector<24x256xf32>
    %89 = arith.addf %84, %88 : vector<24x256xf32>
    %c0_18 = arith.constant 0 : index
    %c0_19 = arith.constant 0 : index
    %90 = vector.load %arg5[%c0_18, %c0_19] : memref<24x1xf32, #tpu.memory_space<vmem>>, vector<24x1xf32>
    %91 = vector.broadcast %90 : vector<24x1xf32> to vector<24x256xf32>
    %92 = arith.addf %89, %91 : vector<24x256xf32>
    %cst_20 = arith.constant 0.000000e+00 : f32
    %cst_21 = arith.constant 6.000000e+00 : f32
    %93 = vector.broadcast %cst_20 : f32 to vector<24x256xf32>
    %94 = arith.maximumf %93, %92 : vector<24x256xf32>
    %95 = vector.broadcast %cst_21 : f32 to vector<24x256xf32>
    %96 = arith.minimumf %95, %94 : vector<24x256xf32>
    %c0_22 = arith.constant 0 : index
    %c0_23 = arith.constant 0 : index
    %97 = vector.load %arg6[%c0_22, %c0_23] : memref<8x24xf32, #tpu.memory_space<vmem>>, vector<8x24xf32>
    %cst_24 = arith.constant dense<0.000000e+00> : vector<8x256xf32>
    %98 = tpu.matmul %97, %96, %cst_24 {dimension_numbers = #tpu.dot_dimension_numbers<[1], [0], [0], [1], [0, 0, 1, 1], [], []>} : vector<8x24xf32>, vector<24x256xf32>, vector<8x256xf32> -> vector<8x256xf32>
    %c0_25 = arith.constant 0 : index
    %c0_26 = arith.constant 0 : index
    %99 = vector.load %arg7[%c0_25, %c0_26] : memref<8x1xf32, #tpu.memory_space<vmem>>, vector<8x1xf32>
    %100 = vector.broadcast %99 : vector<8x1xf32> to vector<8x256xf32>
    %101 = arith.addf %98, %100 : vector<8x256xf32>
    %102 = arith.addf %101, %1 : vector<8x256xf32>
    %c0_27 = arith.constant 0 : index
    %c0_28 = arith.constant 0 : index
    %c0_29 = arith.constant 0 : index
    %103 = vector.load %arg8[%c0_27, %c0_28, %c0_29] : memref<1x8x256xf32, #tpu.memory_space<vmem>>, vector<1x8x256xf32>
    %104 = vector.shape_cast %103 : vector<1x8x256xf32> to vector<8x256xf32>
    %105 = vector.shape_cast %102 : vector<8x256xf32> to vector<1x8x256xf32>
    tpu.vector_store %arg8[%c0_27, %c0_28, %c0_29], %105 {strides = array<i32>} : memref<1x8x256xf32, #tpu.memory_space<vmem>>, vector<1x8x256xf32>,
    return
  }
  func.func @transform_0(%arg0: i32) -> (i32, i32, i32) {
    %c0_i32 = arith.constant 0 : i32
    %c0_i32_0 = arith.constant 0 : i32
    %c0_i32_1 = arith.constant 0 : i32
    return %arg0, %c0_i32, %c0_i32_0 : i32, i32, i32
  }
  func.func @transform_1(%arg0: i32) -> (i32, i32) {
    %c0_i32 = arith.constant 0 : i32
    %c0_i32_0 = arith.constant 0 : i32
    %c0_i32_1 = arith.constant 0 : i32
    return %c0_i32, %c0_i32_0 : i32, i32
  }
  func.func @transform_2(%arg0: i32) -> (i32, i32) {
    %c0_i32 = arith.constant 0 : i32
    %c0_i32_0 = arith.constant 0 : i32
    %c0_i32_1 = arith.constant 0 : i32
    return %c0_i32, %c0_i32_0 : i32, i32
  }
  func.func @transform_3(%arg0: i32) -> (i32, i32) {
    %c0_i32 = arith.constant 0 : i32
    %c0_i32_0 = arith.constant 0 : i32
    %c0_i32_1 = arith.constant 0 : i32
    return %c0_i32, %c0_i32_0 : i32, i32
  }
  func.func @transform_4(%arg0: i32) -> (i32, i32) {
    %c0_i32 = arith.constant 0 : i32
    %c0_i32_0 = arith.constant 0 : i32
    %c0_i32_1 = arith.constant 0 : i32
    return %c0_i32, %c0_i32_0 : i32, i32
  }
  func.func @transform_5(%arg0: i32) -> (i32, i32) {
    %c0_i32 = arith.constant 0 : i32
    %c0_i32_0 = arith.constant 0 : i32
    %c0_i32_1 = arith.constant 0 : i32
    return %c0_i32, %c0_i32_0 : i32, i32
  }
  func.func @transform_6(%arg0: i32) -> (i32, i32) {
    %c0_i32 = arith.constant 0 : i32
    %c0_i32_0 = arith.constant 0 : i32
    %c0_i32_1 = arith.constant 0 : i32
    return %c0_i32, %c0_i32_0 : i32, i32
  }
  func.func @transform_7(%arg0: i32) -> (i32, i32, i32) {
    %c0_i32 = arith.constant 0 : i32
    %c0_i32_0 = arith.constant 0 : i32
    %c0_i32_1 = arith.constant 0 : i32
    return %arg0, %c0_i32, %c0_i32_0 : i32, i32, i32
  }
}

</mosaic_0001>

<bundles_post_ra>
// kernel: tpu_custom_call.1
= control target key start
LH: loop header
LB: loop body
LE: loop exit
PB: predicated region body
PF: predicated region fallthrough
CT: control target
= control target key end

     0   :  { %12 = vsyncpa [#allocation3], 0  ;;  %s2078_s0 = inlined_call_operand.vmem [shape: f32[2,8,256], index: 0, kind: input, shape index: {}]   ;;  %s2079_s1 = inlined_call_operand.vmem [shape: f32[24,8], index: 1, kind: input, shape index: {}]   ;;  %s2080_s2 = inlined_call_operand.vmem [shape: f32[24,1], index: 2, kind: input, shape index: {}]   ;;  %s2081_s3 = inlined_call_operand.vmem [shape: f32[24,9], index: 3, kind: input, shape index: {}]   ;;  %s2082_s4 = inlined_call_operand.vmem [shape: f32[24,1], index: 4, kind: input, shape index: {}]   ;;  %s2083_s5 = inlined_call_operand.vmem [shape: f32[8,24], index: 5, kind: input, shape index: {}]   ;;  %s2084_s6 = inlined_call_operand.vmem [shape: f32[8,1], index: 6, kind: input, shape index: {}]   ;;  %s2085_s7 = inlined_call_operand.hbm [shape: f32[2,8,256], index: 7, kind: output, shape index: {}]  }
   0x1   :  { %14 = vsyncpa [#allocation3 + $0x1], 0  ;;  %s1509_s24 = smov 0   ;;  %s1511_s25 = smov 0  }
   0x2   :  { %s1513_s26 = smov 0   ;;  %s1515_s27 = smov 0  }
   0x3 LB: > { %s1530_s28 = sadd.s32 4294967295, %s1448_s27   ;;  %s1284_s29 = sadd.s32 4294967294, %s1448_s27   ;;  %s1448_s27 = sphi %s1515_s27, %s2099_s27   ;;  %s1444_s26 = sphi %s1513_s26, %s2098_s26   ;;  %s1440_s25 = sphi %s1511_s25, %s2097_s25   ;;  %s1436_s24 = sphi %s1509_s24, %s2096_s24  }
   0x4   : > { %s1534_s30 = sadd.s32 1, %s1448_s27   ;;  %s179_s8 = sadd.s32 1, %s1444_s26 }
   0x5   : > { %s176_s9 = ssub.s32 %s1448_s27, %s1534_s30  ;;  %p189_p0 = scmp.ne.s32.totalorder %s1444_s26, %s1440_s25 }
   0x6   : > { %p177_p1 = scmp.eq.s32.totalorder %s176_s9, 0  ;;  %p190_p2 = scmp.eq.s32.totalorder %s1530_s28, 1 }
   0x7   : > { %p195_p3 = scmp.ne.s32.totalorder %s1440_s25, %s1436_s24  ;;  %p196_p4 = scmp.eq.s32.totalorder %s1284_s29, 1 }
   0x8   : > { %s1545_s10 = scalar_select %p177_p1, %s1444_s26, %s179_s8  }
   0x9   : > { %p1547_p5 = por %p190_p2, %p189_p0  ;;  %p1551_p6 = por %p196_p4, %p195_p3 }
   0xa   : > { %p1287_p7 = scmp.ge.s32.totalorder %s1448_s27, 1  ;;  %p240_p8 = scmp.lt.s32.totalorder %s1448_s27, 3 }
   0xc   : > { %p241_p9 = pnand %p1287_p7, %p240_p8 }
   0xd   : > { %p272_p10 = scmp.lt.s32.totalorder (!%p241_p9), %s1530_s28, 1  ;;  %s1460_s15 = smov (!%p241_p9), 17  }
   0xe   : > { %244 = sbr.rel (%p241_p9) target bundleno = 809 (0x329), region = 48  ;;  %s1461_s16 = smov (!%p241_p9), 95  }
   0xf   : > { %s1464_s19 = smov (!%p241_p9), 126   ;;  %s1465_s20 = smov (!%p241_p9), 96  }
  0x10   : > { %s1466_s22 = smov (!%p241_p9), 112   ;;  %s1467_s23 = smov (!%p241_p9), 94  }
  0x11   : > { %s269_s14 = sand.u32 (!%p241_p9), 1, %s1440_s25  }
  0x13   : > { %v1450_v0 = vmov 0.0   ;;  %v1451_v1 = vmov 1   ;;  %v1561_v2 = vld [vmem:[%s2081_s3 + $0x8] sm:$0xff]  ;;  %v282_v3 = vld [vmem:[%s2080_s2] sm:$0xff]  ;;  %s273_s17 = scalar_select %p272_p10, %s1530_s28, 1  ;;  %v1452_v4 = vmov 0   ;;  %v405_v45 = vlaneseq }
  0x14   : > { %374 = vmatprep.mubr.f32.mxu0 %v1450_v0  ;;  %1361 = vset.pattern.permute.xlu0 %v1451_v1  ;;  %v279_v5 = vld [vmem:[%s2079_s1] sm:$0xff]  ;;  %vm300_vm0 = vcmask 64512   ;;  %v1453_v8 = vmov 2   ;;  %v1582_v9 = vld [vmem:[%s2081_s3 + $0x10] sm:$0xff]  ;;  %v280_v10 = vld [vmem:[%s2079_s1 + $0x8] sm:$0xff]  ;;  %v1454_v11 = vmov 3  }
  0x15   : > { %1359 = vset.pattern.permute.xlu1 %v1452_v4  ;;  %600 = vperm.xlu0 %1361, %v1561_v2   ;;  %s1300_s18 = sshll.u32 %s273_s17, 4  ;;  %v281_v12 = vld [vmem:[%s2079_s1 + $0x10] sm:$0xff]  ;;  %v565_v13 = vld [vmem:[%s2081_s3] sm:$0xff]  ;;  %v1455_v14 = vmov 5   ;;  %v1456_v15 = vmov 6   ;;  %v1457_v16 = vmov 7  }
  0x16   : > { %287 = vperm.xlu1 %1359, %v282_v3   ;;  %1199 = vmatprep.mubr.f32.mxu1 %v1450_v0  ;;  %s1572_s21 = scalar_lea.vmem %s2078_s0, %s1300_s18  ;;  %v1458_v17 = vmov 8   ;;  %v284_v18 = vld [vmem:[%s2080_s2 + $0x10] sm:$0xff]  ;;  %v283_v19 = vld [vmem:[%s2080_s2 + $0x8] sm:$0xff]  ;;  %v1459_v20 = vmov 4   ;;  %v1088_v23 = vld [vmem:[%s2082_s4] sm:$0xff]  ;;  %v406_v47 = vand.u32 127, %v405_v45 }
  0x17   : > { %v278_v6 = vld [vmem:[%s1572_s21 + $0x8] sm:$0xff]  ;;  %v277_v7 = vld [vmem:[%s1572_s21] sm:$0xff]  ;;  %v1090_v21 = vld [vmem:[%s2082_s4 + $0x10] sm:$0xff]  ;;  %vm462_vm5 = vcmask 138240   ;;  %s1462_s17 = smov 127   ;;  %s1463_s18 = smov 110  }
  0x18   : > { %340 = vmatprep.subr.mxu0 %v278_v6  ;;  %v1089_v22 = vld [vmem:[%s2082_s4 + $0x8] sm:$0xff]  ;;  %v412_v51 = vand.u32 15, %v406_v47  ;;  %v407_v57 = vadd.s32 128, %v406_v47  ;;  %vm643_vm6 = vcmask 1039360   ;;  %vm1002_vm7 = vcmask 777216  }
  0x19   : > { %1364 = vset.pattern.permute.xlu0 %v1453_v8  ;;  %341 = vmatpush1.msra.mxu0 %v277_v7  ;;  %vm710_vm8 = vcmask 1031168   ;;  %vm777_vm9 = vcmask 916480   ;;  %vm868_vm10 = vcmask 900096   ;;  %vm935_vm11 = vcmask 785408  }
  0x1a   : > { %1360 = vset.pattern.permute.xlu1 %v1451_v1  ;;  %667 = vperm.xlu0 %1364, %v1561_v2   ;;  %vm1678_vm1 = vcmp.eq.s32.totalorder %v412_v51, 15  ;;  %vm1689_vm2 = vcmp.eq.s32.totalorder %v412_v51, 0  ;;  %vm1069_vm12 = vcmask 769024   ;;  %vm1131_vm13 = vcmask 195584  }
  0x1b   : > { %1291 = vmatmul.mubr.msk.f32.vlgmr.msra.gmra.mxu0 %vm300_vm0, %v279_v5  ;;  %604 = vperm.xlu1 %1360, %v1582_v9   ;;  %v419_v5 = vand.u32 15, %v407_v57 }
  0x1c   : > { %380 = vmatprep.mubr.f32.mxu0 %v1450_v0 }
  0x1d   : > { %vm1700_vm3 = vcmp.eq.s32.totalorder %v419_v5, 15  ;;  %vm1708_vm4 = vcmp.eq.s32.totalorder %v419_v5, 0 }
  0x1e   : > { %1367 = vset.pattern.permute.xlu0 %v1454_v11 }
  0x1f   : > { %1292 = vmatmul.mubr.msk.f32.gmra.mxu0 %vm300_vm0, %v280_v10  ;;  %1362 = vset.pattern.permute.xlu1 %v1453_v8 }
  0x20   : > { %386 = vmatprep.mubr.f32.mxu0 %v1450_v0  ;;  %734 = vperm.xlu0 %1367, %v1561_v2  }
  0x21   : > { %671 = vperm.xlu1 %1362, %v1582_v9  }
  0x23   : > { %1293 = vmatmul.mubr.msk.f32.gmra.mxu0 %vm300_vm0, %v281_v12 }
  0x24   : > { %730 = vperm.xlu0 %1367, %v565_v13  }
  0x25   : > { %1363 = vset.pattern.permute.xlu1 %v1451_v1 }
  0x26   : > { %596 = vperm.xlu1 %1363, %v565_v13  }
  0x28   : > { %1369 = vset.pattern.permute.xlu0 %v1455_v14 }
  0x29   : > { %825 = vperm.xlu0 %1369, %v1561_v2  }
  0x2a   : > { %1365 = vset.pattern.permute.xlu1 %v1454_v11 }
  0x2b   : > { %738 = vperm.xlu1 %1365, %v1582_v9  }
  0x2d   : > { %1372 = vset.pattern.permute.xlu0 %v1456_v15 }
  0x2e   : > { %892 = vperm.xlu0 %1372, %v1561_v2  }
  0x2f   : > { %1366 = vset.pattern.permute.xlu1 %v1453_v8 }
  0x30   : > { %663 = vperm.xlu1 %1366, %v565_v13  }
  0x32   : > { %1375 = vset.pattern.permute.xlu0 %v1457_v16 }
  0x33   : > { %959 = vperm.xlu0 %1375, %v1561_v2  }
  0x34   : > { %1368 = vset.pattern.permute.xlu1 %v1455_v14 }
  0x35   : > { %829 = vperm.xlu1 %1368, %v1582_v9  }
  0x37   : > { %1378 = vset.pattern.permute.xlu0 %v1458_v17 }
  0x38   : > { %1026 = vperm.xlu0 %1378, %v1561_v2  }
  0x39   : > { %1370 = vset.pattern.permute.xlu1 %v1456_v15 }
  0x3a   : > { %896 = vperm.xlu1 %1370, %v1582_v9  }
  0x3c   : > { %1379 = vset.pattern.permute.xlu0 %v1452_v4 }
  0x3d   : > { %297 = vperm.xlu0 %1379, %v284_v18  }
  0x3e   : > { %1371 = vset.pattern.permute.xlu1 %v1455_v14 }
  0x3f   : > { %821 = vperm.xlu1 %1371, %v565_v13  }
  0x41   : > { %292 = vperm.xlu0 %1379, %v283_v19  }
  0x43   : > { %1373 = vset.pattern.permute.xlu1 %v1457_v16 }
  0x44   : > { %963 = vperm.xlu1 %1373, %v1582_v9  }
  0x45   : > { %575 = vperm.xlu0 %1379, %v1561_v2  }
  0x48   : > { %1374 = vset.pattern.permute.xlu1 %v1456_v15 }
  0x49   : > { %888 = vperm.xlu1 %1374, %v565_v13   ;;  %1383 = vset.pattern.permute.xlu0 %v1459_v20 }
  0x4a   : > { %797 = vperm.xlu0 %1383, %v565_v13  }
  0x4d   : > { %1376 = vset.pattern.permute.xlu1 %v1458_v17 }
  0x4e   : > { %1030 = vperm.xlu1 %1376, %v1582_v9   ;;  %1385 = vset.pattern.permute.xlu0 %v1452_v4 }
  0x52   : > { %1377 = vset.pattern.permute.xlu1 %v1457_v16 }
  0x53   : > { %955 = vperm.xlu1 %1377, %v565_v13  }
  0x57   : > { %1380 = vset.pattern.permute.xlu1 %v1458_v17 }
  0x58   : > { %1022 = vperm.xlu1 %1380, %v565_v13  }
  0x5c   : > { %1381 = vset.pattern.permute.xlu1 %v1452_v4 }
  0x5d   : > { %580 = vperm.xlu1 %1381, %v1582_v9  }
  0x61   : > { %570 = vperm.xlu1 %1381, %v565_v13  }
  0x65   : > { %1382 = vset.pattern.permute.xlu1 %v1459_v20 }
  0x66   : > { %805 = vperm.xlu1 %1382, %v1582_v9  }
  0x6a   : > { %801 = vperm.xlu1 %1382, %v1561_v2  }
  0x6e   : > { %1384 = vset.pattern.permute.xlu1 %v1452_v4 }
  0x6f   : > { %1103 = vperm.xlu1 %1384, %v1090_v21  }
  0x73   : > { %1098 = vperm.xlu1 %1384, %v1089_v22  }
  0x77   : > { %1093 = vperm.xlu1 %1384, %v1088_v23  }
  0x90   : > { %v1640_v29 = vpop.permute.xlu0 %600 }
  0x91   : > { %v288_v24 = vpop.permute.xlu1 %287 }
  0x95   : > { %v1644_v31 = vpop.permute.xlu0 %667 }
  0x96   : > { %v1632_v25 = vpop.permute.xlu1 %604 }
  0x9b   : > { %v1648_v33 = vpop.permute.xlu0 %734 }
  0x9c   : > { %v1634_v26 = vpop.permute.xlu1 %671 }
  0x9f   : > { %v1654_v36 = vpop.permute.xlu0 %730 }
  0xa1   : > { %v1636_v27 = vpop.permute.xlu1 %596 }
  0xa4   : > { %v1658_v38 = vpop.permute.xlu0 %825 }
  0xa6   : > { %v1638_v28 = vpop.permute.xlu1 %738 }
  0xa9   : > { %v1662_v40 = vpop.permute.xlu0 %892 }
  0xab   : > { %v1642_v30 = vpop.permute.xlu1 %663 }
  0xae   : > { %v1666_v42 = vpop.permute.xlu0 %959 }
  0xb0   : > { %v1646_v32 = vpop.permute.xlu1 %829 }
  0xb3   : > { %v1670_v44 = vpop.permute.xlu0 %1026 }
  0xb5   : > { %v1650_v34 = vpop.permute.xlu1 %896 }
  0xb8   : > { %v298_v49 = vpop.permute.xlu0 %297 }
  0xba   : > { %v1652_v35 = vpop.permute.xlu1 %821 }
  0xbc   : > { %v293_v58 = vpop.permute.xlu0 %292 }
  0xbf   : > { %v1656_v37 = vpop.permute.xlu1 %963 }
  0xc4   : > { %v1660_v39 = vpop.permute.xlu1 %888 }
  0xc9   : > { %v1664_v41 = vpop.permute.xlu1 %1030 }
  0xce   : > { %v1668_v43 = vpop.permute.xlu1 %955 }
  0xd3   : > { %v1672_v46 = vpop.permute.xlu1 %1022 }
  0xd8   : > { %v1674_v48 = vpop.permute.xlu1 %580 }
  0xdb   : > { %v376_v50 = vpop.f32.mrf.mxu0 }
  0xdc   : > { %v377_v52 = vadd.f32 %v376_v50, %v288_v24  ;;  %v1676_v53 = vpop.permute.xlu1 %570 }
  0xdd   : > { %v378_v54 = vpop.f32.mrf.mxu0 }
  0xde   : > { %v393_v55 = vmax.f32 %v377_v52, 0.0  ;;  %v379_v56 = vadd.f32 %v378_v54, %v288_v24 }
  0xdf   : > { %v382_v60 = vpop.f32.mrf.mxu0 }
  0xe0   : > { %v1682_v61 = vmin.f32 %v393_v55, 6.0  ;;  %v383_v62 = vadd.f32 %v382_v60, %v293_v58  ;;  %v394_v63 = vmax.f32 %v379_v56, 0.0 }
  0xe1   : > { %v384_v0 = vpop.f32.mrf.mxu0  ;;  %v806_v1 = vpop.permute.xlu1 %805 }
  0xe2   : > { %487 = vrot.lane.b32.xlu0 %v1682_v61, %s1460_s15  ;;  %v438_v2 = vsel %vm1678_vm1, 0.0, %v1682_v61  ;;  %v395_v3 = vmax.f32 %v383_v62, 0.0  ;;  %v385_v6 = vadd.f32 %v384_v0, %v293_v58  ;;  %v1694_v9 = vmin.f32 %v394_v63, 6.0  ;;  %v1756_v63 = vpop.permute.xlu0 %575 }
  0xe3   : > { %450 = vrot.lane.b32.xlu1 %v438_v2, %s1460_s15  ;;  %v388_v7 = vpop.f32.mrf.mxu0  ;;  %v523_v10 = vsel %vm1689_vm2, 0.0, %v1682_v61 }
  0xe4   : > { %v401_v8 = vmin.f32 %v395_v3, 6.0  ;;  %v396_v11 = vmax.f32 %v385_v6, 0.0  ;;  %v389_v12 = vadd.f32 %v388_v7, %v298_v49  ;;  %v439_v22 = vsel %vm1700_vm3, 0.0, %v1694_v9 }
  0xe5   : > { %v390_v13 = vpop.f32.mrf.mxu0  ;;  %v802_v14 = vpop.permute.xlu1 %801  ;;  %v524_v45 = vsel %vm1708_vm4, 0.0, %v1694_v9 }
  0xe6   : > { %535 = vrot.lane.b32.xlu0 %v523_v10, %s1460_s15  ;;  %v391_v16 = vadd.f32 %v390_v13, %v298_v49  ;;  %v1704_v17 = vmul.f32 %v802_v14, %v401_v8  ;;  %v402_v18 = vmin.f32 %v396_v11, 6.0  ;;  %v397_v20 = vmax.f32 %v389_v12, 0.0 }
  0xe7   : > { %489 = vrot.lane.b32.xlu1 %v1694_v9, %s1460_s15  ;;  %v525_v49 = vsel %vm1689_vm2, 0.0, %v401_v8  ;;  %v440_v52 = vsel %vm1678_vm1, 0.0, %v401_v8 }
  0xe8   : > { %v398_v21 = vmax.f32 %v391_v16, 0.0  ;;  %v403_v23 = vmin.f32 %v397_v20, 6.0  ;;  %v1715_v24 = vmul.f32 %v802_v14, %v402_v18  ;;  %v526_v54 = vsel %vm1708_vm4, 0.0, %v402_v18 }
  0xe9   : > { %v441_v55 = vsel %vm1700_vm3, 0.0, %v402_v18 }
  0xea   : > { %452 = vrot.lane.b32.xlu0 %v439_v22, %s1460_s15  ;;  %v404_v47 = vmin.f32 %v398_v21, 6.0  ;;  %v1724_v50 = vmul.f32 %v806_v1, %v403_v23  ;;  %v527_v57 = vsel %vm1689_vm2, 0.0, %v403_v23  ;;  %v442_v58 = vsel %vm1678_vm1, 0.0, %v403_v23  ;;  %v1754_v62 = vpop.permute.xlu1 %1103 }
  0xeb   : > { %537 = vrot.lane.b32.xlu1 %v524_v45, %s1460_s15 }
  0xec   : > { %v1726_v51 = vmul.f32 %v806_v1, %v404_v47  ;;  %v528_v56 = vsel %vm1708_vm4, 0.0, %v404_v47  ;;  %v443_v60 = vsel %vm1700_vm3, 0.0, %v404_v47  ;;  %v1760_v1 = vpop.permute.xlu0 %797 }
  0xee   : > { %539 = vrot.lane.b32.xlu0 %v525_v49, %s1460_s15  ;;  %v1758_v0 = vpop.permute.xlu1 %1098 }
  0xef   : > { %491 = vrot.lane.b32.xlu1 %v401_v8, %s1460_s15 }
  0xf2   : > { %454 = vrot.lane.b32.xlu0 %v440_v52, %s1460_s15  ;;  %v1762_v2 = vpop.permute.xlu1 %1093 }
  0xf3   : > { %541 = vrot.lane.b32.xlu1 %v526_v54, %s1460_s15 }
  0xf6   : > { %493 = vrot.lane.b32.xlu0 %v402_v18, %s1460_s15 }
  0xf7   : > { %456 = vrot.lane.b32.xlu1 %v441_v55, %s1460_s15 }
  0xfa   : > { %497 = vrot.lane.b32.xlu0 %v404_v47, %s1460_s15 }
  0xfb   : > { %495 = vrot.lane.b32.xlu1 %v403_v23, %s1460_s15 }
  0xfe   : > { %545 = vrot.lane.b32.xlu0 %v528_v56, %s1460_s15 }
  0xff   : > { %543 = vrot.lane.b32.xlu1 %v527_v57, %s1460_s15 }
 0x103   : > { %458 = vrot.lane.b32.xlu1 %v442_v58, %s1460_s15 }
 0x107   : > { %460 = vrot.lane.b32.xlu1 %v443_v60, %s1460_s15  ;;  %s1288_s15 = sshll.u32 %s269_s14, 4 }
 0x154   : > { %v488_v59 = vpop.permute.xlu0 %487 }
 0x155   : > { %v511_v3 = vsel %vm462_vm5, 0.0, %v488_v59  ;;  %v451_v6 = vpop.permute.xlu1 %450 }
 0x156   : > { %v607_v4 = vmul.f32 %v1636_v27, %v511_v3  ;;  %v966_v5 = vmul.f32 %v1668_v43, %v511_v3  ;;  %v1775_v11 = vsel %vm462_vm5, 0.0, %v451_v6 }
 0x157   : > { %v899_v14 = vmul.f32 %v1660_v39, %v1775_v11  ;;  %v741_v16 = vmul.f32 %v1654_v36, %v1775_v11 }
 0x158   : > { %984 = vrot.lane.b32.xlu0 %v966_v5, %s1461_s16  ;;  %v536_v7 = vpop.permute.xlu0 %535  ;;  %625 = vrot.lane.b32.xlu1 %v607_v4, %s1462_s17 }
 0x159   : > { %v1770_v8 = vsel %vm462_vm5, 0.0, %v536_v7  ;;  %v490_v12 = vpop.permute.xlu1 %489 }
 0x15a   : > { %v832_v10 = vmul.f32 %v1652_v35, %v1770_v8  ;;  %v674_v13 = vmul.f32 %v1642_v30, %v1770_v8  ;;  %v499_v15 = vsel %vm462_vm5, %v488_v59, %v490_v12  ;;  %v514_v18 = vsel %vm462_vm5, %v490_v12, 0.0 }
 0x15b   : > { %v608_v19 = vmul.f32 %v1636_v27, %v499_v15  ;;  %v609_v20 = vmul.f32 %v1636_v27, %v514_v18  ;;  %v968_v22 = vmul.f32 %v1668_v43, %v514_v18  ;;  %v967_v45 = vmul.f32 %v1668_v43, %v499_v15 }
 0x15c   : > { %850 = vrot.lane.b32.xlu0 %v832_v10, %s1463_s18  ;;  %692 = vrot.lane.b32.xlu1 %v674_v13, %s1464_s19  ;;  %v453_v47 = vpop.permute.xlu0 %452 }
 0x15d   : > { %v538_v21 = vpop.permute.xlu1 %537  ;;  %v478_v52 = vsel %vm462_vm5, %v453_v47, 0.0  ;;  %v1810_v43 = vsel %vm462_vm5, %v451_v6, %v453_v47 }
 0x15e   : > { %v1795_v23 = vsel %vm462_vm5, %v538_v21, 0.0  ;;  %v1800_v49 = vsel %vm462_vm5, %v536_v7, %v538_v21  ;;  %v743_v55 = vmul.f32 %v1654_v36, %v478_v52  ;;  %v742_v57 = vmul.f32 %v1654_v36, %v1810_v43 }
 0x15f   : > { %v676_v27 = vmul.f32 %v1642_v30, %v1795_v23  ;;  %v675_v54 = vmul.f32 %v1642_v30, %v1800_v49  ;;  %v834_v58 = vmul.f32 %v1652_v35, %v1795_v23  ;;  %v833_v30 = vmul.f32 %v1652_v35, %v1800_v49 }
 0x160   : > { %917 = vrot.lane.b32.xlu0 %v899_v14, %s1465_s20  ;;  %759 = vrot.lane.b32.xlu1 %v741_v16, %s1466_s22  ;;  %v540_v56 = vpop.permute.xlu0 %539  ;;  %v901_v59 = vmul.f32 %v1660_v39, %v478_v52  ;;  %v900_v36 = vmul.f32 %v1660_v39, %v1810_v43 }
 0x161   : > { %v492_v60 = vpop.permute.xlu1 %491  ;;  %v560_v10 = vsel %vm462_vm5, 0.0, %v540_v56 }
 0x162   : > { %v512_v4 = vsel %vm462_vm5, 0.0, %v492_v60  ;;  %v677_v13 = vmul.f32 %v1644_v31, %v560_v10  ;;  %v835_v16 = vmul.f32 %v1658_v38, %v560_v10  ;;  %v1036_v47 = vmul.f32 %v1670_v44, %v560_v10 }
 0x163   : > { %v610_v5 = vmul.f32 %v1640_v29, %v512_v4  ;;  %v969_v35 = vmul.f32 %v1666_v42, %v512_v4 }
 0x164   : > { %627 = vrot.lane.b32.xlu0 %v608_v19, %s1462_s17  ;;  %629 = vrot.lane.b32.xlu1 %v609_v20, %s1462_s17  ;;  %v455_v3 = vpop.permute.xlu0 %454 }
 0x165   : > { %v1832_v6 = vsel %vm462_vm5, 0.0, %v455_v3  ;;  %v542_v14 = vpop.permute.xlu1 %541 }
 0x166   : > { %v744_v12 = vmul.f32 %v1648_v33, %v1832_v6  ;;  %v548_v19 = vsel %vm462_vm5, %v540_v56, %v542_v14  ;;  %v902_v21 = vmul.f32 %v1662_v40, %v1832_v6 }
 0x168   : > { %988 = vrot.lane.b32.xlu0 %v968_v22, %s1461_s16  ;;  %986 = vrot.lane.b32.xlu1 %v967_v45, %s1461_s16  ;;  %v494_v7 = vpop.permute.xlu0 %493  ;;  %v678_v22 = vmul.f32 %v1644_v31, %v548_v19 }
 0x169   : > { %v515_v39 = vsel %vm462_vm5, %v494_v7, 0.0  ;;  %v457_v20 = vpop.permute.xlu1 %456 }
 0x16a   : > { %v612_v15 = vmul.f32 %v1640_v29, %v515_v39  ;;  %v971_v18 = vmul.f32 %v1666_v42, %v515_v39  ;;  %v479_v45 = vsel %vm462_vm5, %v457_v20, 0.0 }
 0x16b   : > { %v746_v52 = vmul.f32 %v1648_v33, %v479_v45 }
 0x16c   : > { %696 = vrot.lane.b32.xlu0 %v676_v27, %s1464_s19  ;;  %694 = vrot.lane.b32.xlu1 %v675_v54, %s1464_s19  ;;  %v500_v27 = vsel %vm462_vm5, %v492_v60, %v494_v7  ;;  %v563_v54 = vsel %vm462_vm5, %v542_v14, 0.0  ;;  %v904_v60 = vmul.f32 %v1662_v40, %v479_v45  ;;  %v498_v39 = vpop.permute.xlu0 %497 }
 0x16d   : > { %v837_v56 = vmul.f32 %v1658_v38, %v563_v54  ;;  %v1038_v4 = vmul.f32 %v1670_v44, %v563_v54 }
 0x170   : > { %763 = vrot.lane.b32.xlu0 %v743_v55, %s1466_s22  ;;  %761 = vrot.lane.b32.xlu1 %v742_v57, %s1466_s22  ;;  %v611_v55 = vmul.f32 %v1640_v29, %v500_v27  ;;  %v970_v57 = vmul.f32 %v1666_v42, %v500_v27  ;;  %v1873_v29 = vsel %vm462_vm5, %v455_v3, %v457_v20 }
 0x171   : > { %v903_v10 = vmul.f32 %v1662_v40, %v1873_v29 }
 0x174   : > { %854 = vrot.lane.b32.xlu0 %v834_v58, %s1463_s18  ;;  %852 = vrot.lane.b32.xlu1 %v833_v30, %s1463_s18  ;;  %v496_v58 = vpop.permute.xlu1 %495  ;;  %v679_v30 = vmul.f32 %v1644_v31, %v563_v54  ;;  %v836_v31 = vmul.f32 %v1658_v38, %v548_v19 }
 0x175   : > { %v513_v42 = vsel %vm462_vm5, 0.0, %v496_v58  ;;  %v501_v14 = vsel %vm462_vm5, %v496_v58, %v498_v39 }
 0x176   : > { %v973_v20 = vmul.f32 %v1656_v37, %v501_v14 }
 0x178   : > { %921 = vrot.lane.b32.xlu0 %v901_v59, %s1465_s20  ;;  %919 = vrot.lane.b32.xlu1 %v900_v36, %s1465_s20  ;;  %v544_v59 = vpop.permute.xlu1 %543  ;;  %v745_v36 = vmul.f32 %v1648_v33, %v1873_v29 }
 0x179   : > { %v561_v38 = vsel %vm462_vm5, 0.0, %v544_v59 }
 0x17a   : > { %v680_v40 = vmul.f32 %v1634_v26, %v561_v38 }
 0x17c   : > { %631 = vrot.lane.b32.xlu0 %v610_v5, %s1462_s17  ;;  %990 = vrot.lane.b32.xlu1 %v969_v35, %s1461_s16  ;;  %v613_v5 = vmul.f32 %v1632_v25, %v513_v42  ;;  %v459_v3 = vpop.permute.xlu1 %458  ;;  %v972_v35 = vmul.f32 %v1656_v37, %v513_v42 }
 0x17d   : > { %v1888_v7 = vsel %vm462_vm5, 0.0, %v459_v3 }
 0x17e   : > { %v747_v33 = vmul.f32 %v1638_v28, %v1888_v7 }
 0x180   : > { %765 = vrot.lane.b32.xlu0 %v744_v12, %s1466_s22  ;;  %698 = vrot.lane.b32.xlu1 %v677_v13, %s1464_s19  ;;  %v1037_v12 = vmul.f32 %v1670_v44, %v548_v19  ;;  %v838_v13 = vmul.f32 %v1646_v32, %v561_v38  ;;  %v614_v44 = vmul.f32 %v1632_v25, %v501_v14  ;;  %v516_v19 = vsel %vm462_vm5, %v498_v39, 0.0  ;;  %v461_v45 = vpop.permute.xlu1 %460 }
 0x181   : > { %v480_v27 = vsel %vm462_vm5, %v461_v45, 0.0 }
 0x184   : > { %635 = vrot.lane.b32.xlu0 %v612_v15, %s1462_s17  ;;  %856 = vrot.lane.b32.xlu1 %v835_v16, %s1463_s18  ;;  %v905_v15 = vmul.f32 %v1650_v34, %v1888_v7  ;;  %v546_v16 = vpop.permute.xlu0 %545 }
 0x185   : > { %v564_v54 = vsel %vm462_vm5, %v546_v16, 0.0 }
 0x186   : > { %v1041_v42 = vmul.f32 %v1664_v41, %v564_v54 }
 0x188   : > { %994 = vrot.lane.b32.xlu0 %v971_v18, %s1461_s16  ;;  %923 = vrot.lane.b32.xlu1 %v902_v21, %s1465_s20  ;;  %v1039_v18 = vmul.f32 %v1664_v41, %v561_v38  ;;  %v549_v21 = vsel %vm462_vm5, %v544_v59, %v546_v16 }
 0x18c   : > { %700 = vrot.lane.b32.xlu0 %v678_v22, %s1464_s19  ;;  %1057 = vrot.lane.b32.xlu1 %v1036_v47, %s1467_s23  ;;  %v615_v22 = vmul.f32 %v1632_v25, %v516_v19  ;;  %v681_v47 = vmul.f32 %v1634_v26, %v549_v21  ;;  %v682_v25 = vmul.f32 %v1634_v26, %v564_v54 }
 0x18d   : > { %v840_v26 = vmul.f32 %v1646_v32, %v564_v54 }
 0x190   : > { %769 = vrot.lane.b32.xlu0 %v746_v52, %s1466_s22  ;;  %633 = vrot.lane.b32.xlu1 %v611_v55, %s1462_s17  ;;  %v974_v52 = vmul.f32 %v1656_v37, %v516_v19  ;;  %v749_v55 = vmul.f32 %v1638_v28, %v480_v27  ;;  %v808_v19 = vmul.f32 %v1760_v1, %v1682_v61 }
 0x194   : > { %860 = vrot.lane.b32.xlu0 %v837_v56, %s1463_s18  ;;  %992 = vrot.lane.b32.xlu1 %v970_v57, %s1461_s16  ;;  %v1928_v56 = vsel %vm462_vm5, %v459_v3, %v461_v45  ;;  %v839_v57 = vmul.f32 %v1646_v32, %v549_v21  ;;  %v1033_v3 = vmul.f32 %v1672_v46, %v1770_v8 }
 0x195   : > { %v748_v37 = vmul.f32 %v1638_v28, %v1928_v56  ;;  %v906_v58 = vmul.f32 %v1650_v34, %v1928_v56  ;;  %v1035_v28 = vmul.f32 %v1672_v46, %v1795_v23 }
 0x198   : > { %927 = vrot.lane.b32.xlu0 %v904_v60, %s1465_s20  ;;  %702 = vrot.lane.b32.xlu1 %v679_v30, %s1464_s19  ;;  %v1040_v60 = vmul.f32 %v1664_v41, %v549_v21  ;;  %v907_v30 = vmul.f32 %v1650_v34, %v480_v27  ;;  %v1034_v34 = vmul.f32 %v1672_v46, %v1800_v49 }
 0x199   : > { %v583_v41 = vmul.f32 %v1676_v53, %v1775_v11 }
 0x19c   : > { %1061 = vrot.lane.b32.xlu0 %v1038_v4, %s1467_s23  ;;  %767 = vrot.lane.b32.xlu1 %v745_v36, %s1466_s22  ;;  %v1125_v36 = vld [vmem:[%s2084_s6] sm:$0xff] }
 0x1a0   : > { %637 = vrot.lane.b32.xlu0 %v613_v5, %s1462_s17  ;;  %858 = vrot.lane.b32.xlu1 %v836_v31, %s1463_s18 }
 0x1a4   : > { %996 = vrot.lane.b32.xlu0 %v972_v35, %s1461_s16  ;;  %925 = vrot.lane.b32.xlu1 %v903_v10, %s1465_s20 }
 0x1a8   : > { %771 = vrot.lane.b32.xlu0 %v747_v33, %s1466_s22  ;;  %1059 = vrot.lane.b32.xlu1 %v1037_v12, %s1467_s23  ;;  %v584_v33 = vmul.f32 %v1676_v53, %v1810_v43 }
 0x1ac   : > { %862 = vrot.lane.b32.xlu0 %v838_v13, %s1463_s18  ;;  %704 = vrot.lane.b32.xlu1 %v680_v40, %s1464_s19 }
 0x1b0   : > { %929 = vrot.lane.b32.xlu0 %v905_v15, %s1465_s20  ;;  %639 = vrot.lane.b32.xlu1 %v614_v44, %s1462_s17 }
 0x1b4   : > { %1063 = vrot.lane.b32.xlu0 %v1039_v18, %s1467_s23  ;;  %998 = vrot.lane.b32.xlu1 %v973_v20, %s1461_s16 }
 0x1b8   : > { %641 = vrot.lane.b32.xlu0 %v615_v22, %s1462_s17  ;;  %706 = vrot.lane.b32.xlu1 %v681_v47, %s1464_s19  ;;  %v809_v22 = vmul.f32 %v1760_v1, %v1694_v9  ;;  %s271_s17 = scalar_lea.vmem [#allocation2], %s1288_s15 }
 0x1bc   : > { %1000 = vrot.lane.b32.xlu0 %v974_v52, %s1461_s16  ;;  %775 = vrot.lane.b32.xlu1 %v749_v55, %s1466_s22  ;;  %s1301_s16 = sshll.u32 %s1530_s28, 8  ;;  %s1468_s28 = smov [#allocation2]  }
 0x1bd   : > { %s1392_s8 = sshll.u32 %s1468_s28, 4  ;;  %s1393_s8 = int_to_ptr.vmem [resolvable:$false] %s1392_s8 }
 0x1be   : > { %s1394_s9 = scalar_lea.vmem %s1393_s8, 512 }
 0x1c0   : > { %708 = vrot.lane.b32.xlu0 %v682_v25, %s1464_s19  ;;  %864 = vrot.lane.b32.xlu1 %v839_v57, %s1463_s18 }
 0x1c4   : > { %773 = vrot.lane.b32.xlu0 %v748_v37, %s1466_s22  ;;  %931 = vrot.lane.b32.xlu1 %v906_v58, %s1465_s20  ;;  %s1223_s22 = scalar_lea.hbm %s2085_s7, %s1301_s16 }
 0x1c8   : > { %866 = vrot.lane.b32.xlu0 %v840_v26, %s1463_s18  ;;  %1065 = vrot.lane.b32.xlu1 %v1040_v60, %s1467_s23  ;;  %s1225_s18 = sshll.u32 %s271_s17, 4  ;;  %s1226_s18 = int_to_ptr.vmem [resolvable:$true] %s1225_s18 }
 0x1c9   : > { %s1388_s29 = scalar_lea.vmem %s1226_s18, 256  ;;  %p1395_p0 = scmp.lt.s32.totalorder %s1226_s18, %s1393_s8 }
 0x1ca   : > { %v985_v59 = vpop.permute.xlu0 %984  ;;  %v626_v4 = vpop.permute.xlu1 %625  ;;  %p1389_p11 = scmp.ne.s32.totalorder %s1226_s18, %s1388_s29  ;;  %p1396_p1 = scmp.lt.s32.totalorder %s1394_s9, %s1388_s29 }
 0x1cc   : > { %933 = vrot.lane.b32.xlu0 %v907_v30, %s1465_s20  ;;  %1055 = vrot.lane.b32.xlu1 %v1035_v28, %s1467_s23  ;;  %p1390_p12 = pnand %p1389_p11, %p1547_p5  ;;  %p1397_p2 = por %p1396_p1, %p1395_p0 }
 0x1ce   : > { %v851_v32 = vpop.permute.xlu0 %850  ;;  %v693_v5 = vpop.permute.xlu1 %692  ;;  %p1391_p13 = pneg %p1390_p12 }
 0x1d0   : > { %1067 = vrot.lane.b32.xlu0 %v1041_v42, %s1467_s23  ;;  %1128 = vperm.xlu1 %1384, %v1125_v36   ;;  %p1398_p3 = pnand %p1397_p2, %p1391_p13 }
 0x1d2   : > { %v918_v31 = vpop.permute.xlu0 %917  ;;  %v760_v23 = vpop.permute.xlu1 %759 }
 0x1d4   : > { %1053 = vrot.lane.b32.xlu0 %v1034_v34, %s1467_s23 }
 0x1d6   : > { %v628_v35 = vpop.permute.xlu0 %627  ;;  %v630_v49 = vpop.permute.xlu1 %629 }
 0x1d7   : > { %v644_v10 = vsel %vm643_vm6, %v626_v4, %v628_v35  ;;  %v645_v12 = vsel %vm643_vm6, %v628_v35, %v630_v49 }
 0x1d8   : > { %v656_v38 = vadd.f32 %v644_v10, %v583_v41  ;;  %1051 = vrot.lane.b32.xlu0 %v1033_v3, %s1467_s23  ;;  %v657_v39 = vadd.f32 %v645_v12, %v584_v33  ;;  %v585_v10 = vmul.f32 %v1756_v63, %v1832_v6  ;;  %v586_v33 = vmul.f32 %v1756_v63, %v1873_v29  ;;  %s1211_s23 = scalar_lea.sflag [#allocation3], %s269_s14 }
 0x1da   : > { %v989_v13 = vpop.permute.xlu0 %988  ;;  %v987_v40 = vpop.permute.xlu1 %986 }
 0x1db   : > { %v1003_v11 = vsel %vm1002_vm7, %v985_v59, %v987_v40  ;;  %v1004_v46 = vsel %vm1002_vm7, %v987_v40, %v989_v13 }
 0x1de   : > { %v697_v8 = vpop.permute.xlu0 %696  ;;  %v695_v14 = vpop.permute.xlu1 %694 }
 0x1df   : > { %v711_v15 = vsel %vm710_vm8, %v693_v5, %v695_v14  ;;  %v712_v53 = vsel %vm710_vm8, %v695_v14, %v697_v8 }
 0x1e0   : > { %v723_v43 = vadd.f32 %v711_v15, %v656_v38  ;;  %v724_v44 = vadd.f32 %v712_v53, %v657_v39 }
 0x1e2   : > { %v764_v16 = vpop.permute.xlu0 %763  ;;  %v762_v18 = vpop.permute.xlu1 %761 }
 0x1e3   : > { %v778_v20 = vsel %vm777_vm9, %v760_v23, %v762_v18  ;;  %v779_v21 = vsel %vm777_vm9, %v762_v18, %v764_v16 }
 0x1e4   : > { %v790_v45 = vadd.f32 %v778_v20, %v723_v43  ;;  %v791_v47 = vadd.f32 %v779_v21, %v724_v44 }
 0x1e6   : > { %v855_v27 = vpop.permute.xlu0 %854  ;;  %v814_v52 = vadd.f32 %v808_v19, %v790_v45  ;;  %v815_v54 = vadd.f32 %v809_v22, %v791_v47  ;;  %v853_v55 = vpop.permute.xlu1 %852 }
 0x1e7   : > { %v869_v25 = vsel %vm868_vm10, %v851_v32, %v853_v55  ;;  %v870_v57 = vsel %vm868_vm10, %v853_v55, %v855_v27 }
 0x1e8   : > { %v881_v37 = vadd.f32 %v869_v25, %v814_v52  ;;  %v882_v61 = vadd.f32 %v870_v57, %v815_v54 }
 0x1ea   : > { %v922_v58 = vpop.permute.xlu0 %921  ;;  %v920_v26 = vpop.permute.xlu1 %919 }
 0x1eb   : > { %v936_v60 = vsel %vm935_vm11, %v918_v31, %v920_v26  ;;  %v937_v9 = vsel %vm935_vm11, %v920_v26, %v922_v58 }
 0x1ec   : > { %v948_v1 = vadd.f32 %v936_v60, %v881_v37  ;;  %v949_v30 = vadd.f32 %v937_v9, %v882_v61 }
 0x1ee   : > { %v632_v59 = vpop.permute.xlu0 %631  ;;  %v991_v4 = vpop.permute.xlu1 %990  ;;  %v1979_v28 = vadd.f32 %v1004_v46, %v949_v30  ;;  %v1981_v42 = vadd.f32 %v1003_v11, %v948_v1 }
 0x1f2   : > { %v766_v32 = vpop.permute.xlu0 %765  ;;  %v699_v36 = vpop.permute.xlu1 %698 }
 0x1f6   : > { %v636_v5 = vpop.permute.xlu0 %635  ;;  %v857_v34 = vpop.permute.xlu1 %856 }
 0x1fa   : > { %v995_v23 = vpop.permute.xlu0 %994  ;;  %v924_v41 = vpop.permute.xlu1 %923 }
 0x1fe   : > { %v701_v3 = vpop.permute.xlu0 %700  ;;  %v1983_v35 = vpop.permute.xlu1 %1057 }
 0x1ff   : > { %v713_v6 = vsel %vm710_vm8, %v699_v36, %v701_v3 }
 0x202   : > { %v770_v31 = vpop.permute.xlu0 %769  ;;  %v634_v38 = vpop.permute.xlu1 %633 }
 0x203   : > { %v646_v49 = vsel %vm643_vm6, %v632_v59, %v634_v38  ;;  %v647_v12 = vsel %vm643_vm6, %v634_v38, %v636_v5 }
 0x204   : > { %v658_v39 = vadd.f32 %v646_v49, %v585_v10  ;;  %v659_v13 = vadd.f32 %v647_v12, %v586_v33 }
 0x206   : > { %v861_v40 = vpop.permute.xlu0 %860  ;;  %v993_v11 = vpop.permute.xlu1 %992  ;;  %v725_v43 = vadd.f32 %v713_v6, %v658_v39 }
 0x20a   : > { %v928_v46 = vpop.permute.xlu0 %927  ;;  %v703_v8 = vpop.permute.xlu1 %702 }
 0x20b   : > { %v714_v14 = vsel %vm710_vm8, %v701_v3, %v703_v8 }
 0x20c   : > { %v726_v53 = vadd.f32 %v714_v14, %v659_v13 }
 0x20e   : > { %v1992_v15 = vpop.permute.xlu0 %1061  ;;  %v768_v63 = vpop.permute.xlu1 %767 }
 0x20f   : > { %v780_v29 = vsel %vm777_vm9, %v766_v32, %v768_v63  ;;  %v781_v44 = vsel %vm777_vm9, %v768_v63, %v770_v31 }
 0x210   : > { %v792_v16 = vadd.f32 %v780_v29, %v725_v43  ;;  %v793_v18 = vadd.f32 %v781_v44, %v726_v53 }
 0x212   : > { %v638_v19 = vpop.permute.xlu0 %637  ;;  %v816_v20 = vadd.f32 %v1704_v17, %v792_v16  ;;  %v817_v21 = vadd.f32 %v1715_v24, %v793_v18  ;;  %v859_v22 = vpop.permute.xlu1 %858  ;;  %v1005_v17 = vsel %vm1002_vm7, %v991_v4, %v993_v11  ;;  %v1006_v24 = vsel %vm1002_vm7, %v993_v11, %v995_v23 }
 0x213   : > { %v871_v45 = vsel %vm868_vm10, %v857_v34, %v859_v22  ;;  %v872_v47 = vsel %vm868_vm10, %v859_v22, %v861_v40  ;;  %v587_v4 = vmul.f32 %v1674_v48, %v1888_v7  ;;  %v588_v23 = vmul.f32 %v1674_v48, %v1928_v56 }
 0x214   : > { %v883_v27 = vadd.f32 %v871_v45, %v816_v20  ;;  %v884_v54 = vadd.f32 %v872_v47, %v817_v21 }
 0x216   : > { %v997_v52 = vpop.permute.xlu0 %996  ;;  %v926_v55 = vpop.permute.xlu1 %925 }
 0x217   : > { %v938_v25 = vsel %vm935_vm11, %v924_v41, %v926_v55  ;;  %v939_v57 = vsel %vm935_vm11, %v926_v55, %v928_v46 }
 0x218   : > { %v950_v37 = vadd.f32 %v938_v25, %v883_v27  ;;  %v951_v61 = vadd.f32 %v939_v57, %v884_v54 }
 0x21a   : > { %v772_v58 = vpop.permute.xlu0 %771  ;;  %v1017_v26 = vadd.f32 %v1005_v17, %v950_v37  ;;  %v1018_v60 = vadd.f32 %v1006_v24, %v951_v61  ;;  %v1060_v9 = vpop.permute.xlu1 %1059 }
 0x21b   : > { %v1073_v18 = vsel %vm1069_vm12, %v1060_v9, %v1992_v15  ;;  %v1072_v20 = vsel %vm1069_vm12, %v1983_v35, %v1060_v9 }
 0x21c   : > { %v1085_v27 = vadd.f32 %v1073_v18, %v1018_v60  ;;  %v1084_v25 = vadd.f32 %v1072_v20, %v1017_v26 }
 0x21e   : > { %v863_v1 = vpop.permute.xlu0 %862  ;;  %v705_v30 = vpop.permute.xlu1 %704  ;;  %v1109_v17 = vadd.f32 %v1758_v0, %v1085_v27  ;;  %v1108_v9 = vadd.f32 %v1758_v0, %v1084_v25 }
 0x222   : > { %v930_v59 = vpop.permute.xlu0 %929  ;;  %v640_v32 = vpop.permute.xlu1 %639 }
 0x223   : > { %v648_v10 = vsel %vm643_vm6, %v638_v19, %v640_v32 }
 0x224   : > { %v660_v39 = vadd.f32 %v648_v10, %v587_v4 }
 0x226   : > { %v1064_v36 = vpop.permute.xlu0 %1063  ;;  %v999_v5 = vpop.permute.xlu1 %998 }
 0x227   : > { %v1007_v47 = vsel %vm1002_vm7, %v997_v52, %v999_v5 }
 0x22a   : > { %v642_v34 = vpop.permute.xlu0 %641  ;;  %v707_v41 = vpop.permute.xlu1 %706 }
 0x22b   : > { %v649_v33 = vsel %vm643_vm6, %v640_v32, %v642_v34  ;;  %v715_v49 = vsel %vm710_vm8, %v705_v30, %v707_v41  ;;  %v1114_v34 = vmax.f32 %v1108_v9, 0.0 }
 0x22c   : > { %v661_v13 = vadd.f32 %v649_v33, %v588_v23  ;;  %v727_v11 = vadd.f32 %v715_v49, %v660_v39 }
 0x22d   : > { %v1120_v23 = vmin.f32 %v1114_v34, 6.0 }
 0x22e   : > { %v1001_v3 = vpop.permute.xlu0 %1000  ;;  %v776_v31 = vpop.permute.xlu1 %775 }
 0x22f   : > { %v1008_v57 = vsel %vm1002_vm7, %v999_v5, %v1001_v3  ;;  %v1115_v5 = vmax.f32 %v1109_v17, 0.0 }
 0x232   : > { %v709_v38 = vpop.permute.xlu0 %708  ;;  %v865_v40 = vpop.permute.xlu1 %864 }
 0x233   : > { %v716_v12 = vsel %vm710_vm8, %v707_v41, %v709_v38  ;;  %v873_v29 = vsel %vm868_vm10, %v863_v1, %v865_v40 }
 0x234   : > { %v728_v46 = vadd.f32 %v716_v12, %v661_v13 }
 0x236   : > { %v774_v8 = vpop.permute.xlu0 %773  ;;  %v932_v43 = vpop.permute.xlu1 %931 }
 0x237   : > { %v782_v14 = vsel %vm777_vm9, %v772_v58, %v774_v8  ;;  %v783_v6 = vsel %vm777_vm9, %v774_v8, %v776_v31  ;;  %v940_v19 = vsel %vm935_vm11, %v930_v59, %v932_v43 }
 0x238   : > { %v794_v53 = vadd.f32 %v782_v14, %v727_v11  ;;  %v795_v7 = vadd.f32 %v783_v6, %v728_v46  ;;  %v1386_v11 = vld [vmem:[%s1572_s21] sm:$0xff]  ;;  %v1387_v14 = vld [vmem:[%s1572_s21 + $0x8] sm:$0xff] }
 0x23a   : > { %v818_v48 = vadd.f32 %v1724_v50, %v794_v53  ;;  %v867_v56 = vpop.permute.xlu0 %866  ;;  %v819_v63 = vadd.f32 %v1726_v51, %v795_v7  ;;  %v1066_v45 = vpop.permute.xlu1 %1065 }
 0x23b   : > { %v874_v44 = vsel %vm868_vm10, %v865_v40, %v867_v56  ;;  %v1074_v15 = vsel %vm1069_vm12, %v1064_v36, %v1066_v45 }
 0x23c   : > { %v885_v16 = vadd.f32 %v873_v29, %v818_v48  ;;  %v886_v22 = vadd.f32 %v874_v44, %v819_v63 }
 0x23e   : > { %v952_v21 = vadd.f32 %v940_v19, %v885_v16  ;;  %v934_v50 = vpop.permute.xlu0 %933  ;;  %v1056_v60 = vpop.permute.xlu1 %1055 }
 0x23f   : > { %v941_v51 = vsel %vm935_vm11, %v932_v43, %v934_v50 }
 0x240   : > { %v1019_v54 = vadd.f32 %v1007_v47, %v952_v21  ;;  %v953_v55 = vadd.f32 %v941_v51, %v886_v22 }
 0x242   : > { %v1086_v37 = vadd.f32 %v1074_v15, %v1019_v54  ;;  %v1068_v61 = vpop.permute.xlu0 %1067  ;;  %v1020_v58 = vadd.f32 %v1008_v57, %v953_v55 }
 0x243   : > { %v1075_v35 = vsel %vm1069_vm12, %v1066_v45, %v1068_v61 }
 0x244   : > { %v1087_v24 = vadd.f32 %v1075_v35, %v1020_v58  ;;  %v1110_v52 = vadd.f32 %v1754_v62, %v1086_v37 }
 0x246   : > { %v1054_v1 = vpop.permute.xlu0 %1053  ;;  %v1111_v26 = vadd.f32 %v1754_v62, %v1087_v24  ;;  %v1116_v59 = vmax.f32 %v1110_v52, 0.0  ;;  %v1121_v62 = vmin.f32 %v1115_v5, 6.0 }
 0x247   : > { %v1071_v30 = vsel %vm1069_vm12, %v1054_v1, %v1056_v60 }
 0x248   : > { %v1083_v32 = vadd.f32 %v1071_v30, %v1979_v28  ;;  %v1117_v36 = vmax.f32 %v1111_v26, 0.0  ;;  %v1122_v33 = vmin.f32 %v1116_v59, 6.0 }
 0x24a   : > { %v1107_v41 = vadd.f32 %v1762_v2, %v1083_v32  ;;  %v1052_v3 = vpop.permute.xlu0 %1051  ;;  %v1123_v31 = vmin.f32 %v1117_v36, 6.0 }
 0x24b   : > { %v1070_v10 = vsel %vm1069_vm12, %v1052_v3, %v1054_v1  ;;  %v1129_v39 = vpop.permute.xlu1 %1128 }
 0x24c   : > { %v1082_v0 = vadd.f32 %v1070_v10, %v1981_v42  ;;  %1161 = vmatprep.subr.mxu1 %v1123_v31  ;;  %v1113_v4 = vmax.f32 %v1107_v41, 0.0  ;;  %v1124_v42 = vld [vmem:[%s2083_s5] sm:$0xff] }
 0x24d   : > { %1162 = vmatpush1.msra.mxu1 %v1122_v33 }
 0x24e   : > { %v1106_v28 = vadd.f32 %v1762_v2, %v1082_v0  ;;  %1163 = vmatprep.subr.mxu1 %v1121_v62  ;;  %v1119_v38 = vmin.f32 %v1113_v4, 6.0 }
 0x24f   : > { %1164 = vmatpush1.msra.mxu1 %v1120_v23 }
 0x250   : > { %1165 = vmatprep.subr.mxu1 %v1119_v38  ;;  %v1112_v49 = vmax.f32 %v1106_v28, 0.0 }
 0x252   : > { %v1118_v12 = vmin.f32 %v1112_v49, 6.0 }
 0x254   : > { %1166 = vmatpush1.msra.mxu1 %v1118_v12 }
 0x255   : > { %1294 = vmatmul.mubr.msk.f32.vlgmr.msra.gmra.mxu1 %vm1131_vm13, %v1124_v42 }
 0x315   : > { %v1201_v2 = vpop.f32.mrf.mxu1 }
 0x316   : > { %v1202_v13 = vadd.f32 %v1201_v2, %v1129_v39 }
 0x317   : > { %v1203_v40 = vpop.f32.mrf.mxu1 }
 0x318   : > { %v1206_v46 = vadd.f32 %v1386_v11, %v1202_v13  ;;  %v1204_v8 = vadd.f32 %v1203_v40, %v1129_v39 }
 0x31a   : > { %1208 = vst [vmem:[%s271_s17] sm:$0xff] %v1206_v46  ;;  %v1207_v6 = vadd.f32 %v1387_v14, %v1204_v8 }
 0x31c   : > { %1209 = vst [vmem:[%s271_s17 + $0x8] sm:$0xff] %v1207_v6 }
 0x31d   : > { %1401 = shalt.err (!%p1398_p3)
}
 0x31e   : > { %s1402_s21 = scalar_lea.hbm %s1223_s22, 256  ;;  %s1406_s15 = scalar_lea.hbm %s2085_s7, 512 }
 0x31f   : > { %p1403_p4 = scmp.ne.s32.totalorder %s1223_s22, %s1402_s21  ;;  %p1407_p9 = scmp.lt.s32.totalorder %s1223_s22, %s2085_s7 }
 0x320   : > { %p1408_p10 = scmp.lt.s32.totalorder %s1406_s15, %s1402_s21 }
 0x321   : > { %p1404_p7 = pnand %p1403_p4, %p1547_p5 }
 0x322   : > { %p1409_p11 = por %p1408_p10, %p1407_p9 }
 0x323   : > { %p1405_p8 = pneg %p1404_p7 }
 0x325   : > { %p1410_p12 = pnand %p1409_p11, %p1405_p8 }
 0x327   : > { %1413 = shalt.err (!%p1410_p12)
}
 0x328   : > { %1302 = dma.vmem_to_hbm [thread:$0]  (%p1547_p5), %s1226_s18, 256, %s1223_s22, %s1211_s23  }
 0x329 PF: > { %p1308_p13 = scmp.ge.s32.totalorder %s1448_s27, 2  ;;  %s1237_s19 = sand.u32 1, %s1436_s24  }
 0x32a   : > { %s1238_s20 = scalar_lea.sflag [#allocation3], %s1237_s19 }
 0x32b   : > { %p1305_p0 = pnand %p1308_p13, %p1551_p6 }
 0x32d   : > { %p1306_p1 = pneg %p1305_p0 }
 0x32f   : > { %1431 = dma.done.wait (%p1306_p1), %s1238_s20, 256  }
 0x330   : > { %1433 = vsyncadd (%p1306_p1), %s1238_s20, 4294967040  ;;  %p17_p2 = scmp.ge.s32.totalorder %s1534_s30, 4   ;;  %s2096_s24 = smov %s1440_s25 }
 0x331   : > { %s2097_s25 = smov %s1444_s26  ;;  %s2098_s26 = smov %s1545_s10 }
 0x332   : > { %s2099_s27 = smov %s1534_s30  ;;  %19 = sbr.rel (!%p17_p2) target bundleno = 3 (0x3), region = 83 }
 0x337   :  { %1243 = vsyncpa [#allocation3], 1 }
 0x338   :  { %1245 = vsyncpa [#allocation3 + $0x1], 1 }

</bundles_post_ra>
